<compile_context>
chip_gen: v5e
topology: v5e:2x2
jax: 0.10.0
libtpu: 0.0.40
codegen_flags: <defaults>
</compile_context>

<pallas_src>
import jax
import jax.numpy as jnp
from jax.experimental import pallas as pl
from jax.experimental.pallas import tpu as pltpu


# ---------------------------------------------------------------------------
# Kernels
# ---------------------------------------------------------------------------

def _rope_kernel_fused(cos_ref, sin_ref, q_ref, k_ref, qo_ref, ko_ref):
    """Lane-dense path. q/k/qo/ko blocks: (1, tS, H*D).

    cos_ref: (tS, D) compute dtype.
    sin_ref: (tS, D) compute dtype with the sign folded in:
             sin_ref[..., 2i] = -sin_i, sin_ref[..., 2i+1] = +sin_i.
    """
    ts, hd = qo_ref.shape[1], qo_ref.shape[2]
    d = cos_ref.shape[1]
    h = hd // d
    cdt = cos_ref.dtype

    # Broadcast the (tS, D) tables across heads inside VMEM.  Cheap VPU/XLU
    # work hidden under the HBM DMA; pre-tiling in HBM would multiply table
    # traffic by H.
    cos = jnp.tile(cos_ref[...], (1, h))          # (tS, H*D)
    sin = jnp.tile(sin_ref[...], (1, h))          # (tS, H*D), signs folded in

    lane = jax.lax.broadcasted_iota(jnp.int32, (ts, hd), 1)
    is_even = (lane % 2) == 0

    def rotate(x):
        xc = x.astype(cdt)
        # Pair swap via XLU rotates + VPU select (sign lives in `sin`):
        #   roll by hd-1 (== -1): lane i reads lane i+1  -> even lanes get odd partner
        #   roll by 1          : lane i reads lane i-1  -> odd lanes get even partner
        swapped = jnp.where(is_even,
                            pltpu.roll(xc, shift=hd - 1, axis=1),
                            pltpu.roll(xc, shift=1, axis=1))
        return (xc * cos + swapped * sin).astype(x.dtype)

    qo_ref[0] = rotate(q_ref[0])
    ko_ref[0] = rotate(k_ref[0])


def _rope_kernel_matmul(cos_ref, sin_ref, sw_ref, q_ref, k_ref, qo_ref, ko_ref):
    """General fallback (H*D not a multiple of 128). Blocks: (1, tS, H, D).
    Signed pair swap via a tiny (D, D) 0/+-1 matrix on the MXU; exact thanks to
    precision=HIGHEST."""
    cdt = cos_ref.dtype
    cos = cos_ref[...][None, :, None, :]          # (1, tS, 1, D)
    sin = sin_ref[...][None, :, None, :]
    sw = sw_ref[...]                              # (D, D)
    _, ts, h, d = q_ref.shape

    def rotate(x):
        swapped = jnp.dot(x.reshape(ts * h, d), sw,
                          preferred_element_type=cdt,
                          precision=jax.lax.Precision.HIGHEST
                          ).reshape(1, ts, h, d)
        return (x.astype(cdt) * cos + swapped * sin).astype(x.dtype)

    qo_ref[...] = rotate(q_ref[...])
    ko_ref[...] = rotate(k_ref[...])


# ---------------------------------------------------------------------------
# Wrapper
# ---------------------------------------------------------------------------

def _vmem_budgets():
    """(per-tile byte budget, scoped vmem_limit_bytes), generation aware."""
    try:
        cap = int(pltpu.get_tpu_info().vmem_capacity_bytes)
    except Exception:
        cap = 64 * 1024 * 1024                       # conservative fallback
    if cap >= 100 * 1024 * 1024:                     # v5e / v6e: 128 MiB VMEM
        return 6 * 1024 * 1024, 100 * 1024 * 1024
    # v7x: 64 MiB VMEM per TensorCore -> smaller tiles, <=48 MiB scoped.
    return 3 * 1024 * 1024, 48 * 1024 * 1024


def _choose_block_seq(S, row_bytes, budget_bytes, mult):
    """Largest tS dividing S that is a multiple of `mult` (or == S) and keeps
    one (tS, H*D) tile under budget_bytes."""
    max_ts = max(1, budget_bytes // max(1, row_bytes))
    if S <= max_ts:
        return S
    best = None
    for ts in range(mult, min(S, max_ts) + 1, mult):
        if S % ts == 0:
            best = ts
    return best if best is not None else S


def rotary_position_embedding(query, key, start_pos=0, *, max_positions=2048,
                              compute_dtype=None, block_seq=None,
                              donate_inputs=False):
    """LLaMA-style rotary embedding applied to query and key.

    query, key: [B, S, H, D] with D even.  Returns (query_rot, key_rot) with
    the same shape/dtype."""
    B, S, H, D = query.shape
    assert key.shape == query.shape, "query/key shape mismatch"
    assert key.dtype == query.dtype, "query/key dtype mismatch"
    assert D % 2 == 0, "head_dim must be even"
    assert start_pos + S <= max_positions, "start_pos + seq_len exceeds table"

    in_dtype = query.dtype
    itemsize = jnp.dtype(in_dtype).itemsize
    if compute_dtype is None:
        # bf16 compute on bf16-native VPUs; f32 otherwise.
        # TODO(synk): force f32 compute on v5e (no bf16 VALU) even for bf16 in.
        compute_dtype = jnp.bfloat16 if in_dtype == jnp.bfloat16 else jnp.float32
    cdt_itemsize = jnp.dtype(compute_dtype).itemsize
    sub_mult = max(32 // itemsize, 32 // cdt_itemsize)   # 8 for f32, 16 for bf16

    HD = H * D
    budget, vmem_limit = _vmem_budgets()
    if block_seq is None:
        tS = _choose_block_seq(S, HD * itemsize, budget, sub_mult)
    else:
        tS = int(block_seq)
        assert S % tS == 0 and (tS % sub_mult == 0 or tS == S), "invalid block_seq"
    n_s = S // tS

    # ---- tables: only the [start_pos, start_pos+S) rows, duplicated per pair.
    inv_freq = 1.0 / (10000.0 ** (jnp.arange(0, D, 2, dtype=jnp.float32) / D))
    t = jnp.arange(start_pos, start_pos + S, dtype=jnp.float32)
    freqs = jnp.repeat(jnp.outer(t, inv_freq), 2, axis=-1)           # (S, D)
    cos_tab = jnp.cos(freqs).astype(compute_dtype)
    sin_raw = jnp.sin(freqs)

    nbytes_qk = B * S * HD * itemsize
    cost = pl.CostEstimate(
        flops=int(2 * B * S * HD * 4),
        transcendentals=0,
        bytes_accessed=int(4 * nbytes_qk + 2 * S * D * cdt_itemsize),
    )
    grid = (n_s,) if B == 1 else (n_s, B)
    sem = ("parallel",) if B == 1 else ("parallel", "parallel")
    comp = pltpu.CompilerParams(dimension_semantics=sem,
                                vmem_limit_bytes=vmem_limit)

    if HD % 128 == 0:
        # ------------------ lane-dense fast path ----------------------------
        sign = jnp.where(jnp.arange(D) % 2 == 0, -1.0, 1.0)
        sin_tab = (sin_raw * sign).astype(compute_dtype)             # sign folded

        q3 = query.reshape(B, S, HD)      # contiguous -> free bitcast in HBM
        k3 = key.reshape(B, S, HD)

        if B == 1:
            qk_map = lambda s: (0, s, 0)
            tab_map = lambda s: (s, 0)
        else:
            qk_map = lambda s, b: (b, s, 0)
            tab_map = lambda s, b: (s, 0)
        qk_spec = pl.BlockSpec((1, tS, HD), qk_map)
        tab_spec = pl.BlockSpec((tS, D), tab_map)

        out_shapes = (jax.ShapeDtypeStruct((B, S, HD), in_dtype),
                      jax.ShapeDtypeStruct((B, S, HD), in_dtype))
        aliases = {2: 0, 3: 1} if donate_inputs else {}

        q_rot, k_rot = pl.pallas_call(
            _rope_kernel_fused,
            out_shape=out_shapes,
            grid_spec=pltpu.PrefetchScalarGridSpec(
                num_scalar_prefetch=0, grid=grid,
                in_specs=[tab_spec, tab_spec, qk_spec, qk_spec],
                out_specs=[qk_spec, qk_spec],
            ),
            compiler_params=comp,
            cost_estimate=cost,
            input_output_aliases=aliases,
        )(cos_tab, sin_tab, q3, k3)
        return q_rot.reshape(B, S, H, D), k_rot.reshape(B, S, H, D)

    # ------------------ general fallback (odd H*D) ---------------------------
    sin_tab = sin_raw.astype(compute_dtype)
    row = jnp.arange(D)[:, None]
    col = jnp.arange(D)[None, :]
    sw = jnp.where((row % 2 == 1) & (col == row - 1), -1.0,
                   jnp.where((row % 2 == 0) & (col == row + 1), 1.0, 0.0)
                   ).astype(in_dtype)

    if B == 1:
        qk_map = lambda s: (0, s, 0, 0)
        tab_map = lambda s: (s, 0)
        sw_map = lambda s: (0, 0)
    else:
        qk_map = lambda s, b: (b, s, 0, 0)
        tab_map = lambda s, b: (s, 0)
        sw_map = lambda s, b: (0, 0)
    qk_spec = pl.BlockSpec((1, tS, H, D), qk_map)
    tab_spec = pl.BlockSpec((tS, D), tab_map)
    sw_spec = pl.BlockSpec((D, D), sw_map)

    out_shapes = (jax.ShapeDtypeStruct(query.shape, in_dtype),
                  jax.ShapeDtypeStruct(key.shape, in_dtype))
    aliases = {3: 0, 4: 1} if donate_inputs else {}

    return pl.pallas_call(
        _rope_kernel_matmul,
        out_shape=out_shapes,
        grid_spec=pltpu.PrefetchScalarGridSpec(
            num_scalar_prefetch=0, grid=grid,
            in_specs=[tab_spec, tab_spec, sw_spec, qk_spec, qk_spec],
            out_specs=[qk_spec, qk_spec],
        ),
        compiler_params=comp,
        cost_estimate=cost,
        input_output_aliases=aliases,
    )(cos_tab, sin_tab, sw, query, key)


# ---------------------------------------------------------------------------
# Reference + test
# ---------------------------------------------------------------------------

def _reference_rope(query, key, start_pos=0, max_positions=2048):
    """Pure-JAX reference mirroring the PyTorch complex-number formulation."""
    B, S, H, D = query.shape
    inv_freq = 1.0 / (10000.0 ** (jnp.arange(0, D, 2, dtype=jnp.float32) / D))
    t = jnp.arange(max_positions, dtype=jnp.float32)
    freqs = jnp.outer(t, inv_freq)
    freqs_cis = jnp.exp(1j * freqs.astype(jnp.complex64))[start_pos:start_pos + S]
    freqs_cis = freqs_cis.reshape(1, S, 1, D // 2)

    def apply(x):
        t_dtype = x.dtype
        xc = x.astype(jnp.float32).reshape(B, S, H, D // 2, 2)
        xc = jax.lax.complex(xc[..., 0], xc[..., 1])
        y = xc * freqs_cis
        out = jnp.stack([jnp.real(y), jnp.imag(y)], axis=-1).reshape(B, S, H, D)
        return out.astype(t_dtype)

    return apply(query), apply(key)


if __name__ == "__main__":
    def _check(B, S, H, D, start_pos, block_seq=None):
        rng = jax.random.PRNGKey(0)
        kq, kk = jax.random.split(rng)
        q = jax.random.normal(kq, (B, S, H, D), dtype=jnp.float32)
        k = jax.random.normal(kk, (B, S, H, D), dtype=jnp.float32)
        q_out, k_out = rotary_position_embedding(q, k, start_pos=start_pos,
                                                 block_seq=block_seq)
        jax.block_until_ready((q_out, k_out))
        q_ref, k_ref = _reference_rope(q, k, start_pos=start_pos)
        assert jnp.allclose(q_out, q_ref, atol=1e-5, rtol=1e-5), "query mismatch"
        assert jnp.allclose(k_out, k_ref, atol=1e-5, rtol=1e-5), "key mismatch"

    # Fast lane-dense path: hidden=128, heads=4 -> D=32, H*D=128; multi-tile seq grid.
    _check(B=2, S=16, H=4, D=32, start_pos=0, block_seq=8)
    # Fast path, B=1 (1-D grid), head_dim=128 like the real model, H*D=256, start_pos offset.
    _check(B=1, S=8, H=2, D=128, start_pos=5)
    # General fallback path: hidden=32, heads=4 -> D=8, H*D=32 (not a multiple of 128).
    _check(B=2, S=8, H=4, D=8, start_pos=3)

    print("KERNEL_OK")
</pallas_src>

<mosaic_0001>
module attributes {stable_mosaic.version = 11 : i64} {
  func.func @_rope_kernel_fused(%arg0: i32, %arg1: i32, %arg2: memref<8x32xf32, #tpu.memory_space<vmem>>, %arg3: memref<8x32xf32, #tpu.memory_space<vmem>>, %arg4: memref<1x8x128xf32, #tpu.memory_space<vmem>>, %arg5: memref<1x8x128xf32, #tpu.memory_space<vmem>>, %arg6: memref<1x8x128xf32, #tpu.memory_space<vmem>>, %arg7: memref<1x8x128xf32, #tpu.memory_space<vmem>>) attributes {dimension_semantics = [#tpu.dimension_semantics<parallel>, #tpu.dimension_semantics<parallel>], iteration_bounds = array<i64: 2, 2>, scalar_prefetch = 0 : i64, scratch_operands = 0 : i64, tpu.core_type = #tpu.core_type<tc>, window_params = [{transform_indices = @transform_0, window_bounds = array<i64: 8, 32>}, {transform_indices = @transform_1, window_bounds = array<i64: 8, 32>}, {transform_indices = @transform_2, window_bounds = array<i64: 1, 8, 128>}, {transform_indices = @transform_3, window_bounds = array<i64: 1, 8, 128>}, {transform_indices = @transform_4, window_bounds = array<i64: 1, 8, 128>}, {transform_indices = @transform_5, window_bounds = array<i64: 1, 8, 128>}]} {
    %c0 = arith.constant 0 : index
    %c0_0 = arith.constant 0 : index
    %0 = vector.load %arg2[%c0, %c0_0] : memref<8x32xf32, #tpu.memory_space<vmem>>, vector<8x32xf32>
    %1 = tpu.concatenate %0, %0, %0, %0 in 1 : vector<8x32xf32>, vector<8x32xf32>, vector<8x32xf32>, vector<8x32xf32> -> vector<8x128xf32>
    %c0_1 = arith.constant 0 : index
    %c0_2 = arith.constant 0 : index
    %2 = vector.load %arg3[%c0_1, %c0_2] : memref<8x32xf32, #tpu.memory_space<vmem>>, vector<8x32xf32>
    %3 = tpu.concatenate %2, %2, %2, %2 in 1 : vector<8x32xf32>, vector<8x32xf32>, vector<8x32xf32>, vector<8x32xf32> -> vector<8x128xf32>
    %4 = tpu.iota {dimensions = array<i32: 1>} : vector<8x128xi32>
    %c2_i32 = arith.constant 2 : i32
    %c0_i32 = arith.constant 0 : i32
    %5 = arith.cmpi eq, %c2_i32, %c0_i32 : i32
    %c1_i32 = arith.constant 1 : i32
    %6 = arith.select %5, %c1_i32, %c2_i32 : i32
    %7 = vector.broadcast %6 : i32 to vector<8x128xi32>
    %8 = arith.remsi %4, %7 : vector<8x128xi32>
    %c0_i32_3 = arith.constant 0 : i32
    %9 = vector.broadcast %c0_i32_3 : i32 to vector<8x128xi32>
    %10 = arith.cmpi ne, %8, %9 : vector<8x128xi32>
    %c0_i32_4 = arith.constant 0 : i32
    %11 = vector.broadcast %c0_i32_4 : i32 to vector<8x128xi32>
    %12 = arith.cmpi slt, %8, %11 : vector<8x128xi32>
    %c0_i32_5 = arith.constant 0 : i32
    %13 = arith.cmpi slt, %6, %c0_i32_5 : i32
    %14 = vector.broadcast %13 : i1 to vector<8x128xi1>
    %15 = vector.broadcast %14 : vector<8x128xi1> to vector<8x128xi1>
    %16 = arith.xori %12, %15 : vector<8x128xi1>
    %17 = arith.andi %16, %10 : vector<8x128xi1>
    %18 = vector.broadcast %6 : i32 to vector<8x128xi32>
    %19 = arith.addi %8, %18 : vector<8x128xi32>
    %20 = arith.select %17, %19, %8 : vector<8x128xi1>, vector<8x128xi32>
    %c0_i32_6 = arith.constant 0 : i32
    %21 = vector.broadcast %c0_i32_6 : i32 to vector<8x128xi32>
    %22 = arith.cmpi eq, %20, %21 : vector<8x128xi32>
    %c0_7 = arith.constant 0 : index
    %c0_8 = arith.constant 0 : index
    %c0_9 = arith.constant 0 : index
    %23 = vector.load %arg4[%c0_7, %c0_8, %c0_9] : memref<1x8x128xf32, #tpu.memory_space<vmem>>, vector<1x8x128xf32>
    %24 = vector.shape_cast %23 : vector<1x8x128xf32> to vector<8x128xf32>
    %c127_i32 = arith.constant 127 : i32
    %25 = tpu.dynamic_rotate %24 by %c127_i32 dim 1 : vector<8x128xf32>, i32 -> vector<8x128xf32>
    %c1_i32_10 = arith.constant 1 : i32
    %26 = tpu.dynamic_rotate %24 by %c1_i32_10 dim 1 : vector<8x128xf32>, i32 -> vector<8x128xf32>
    %27 = arith.select %22, %25, %26 : vector<8x128xi1>, vector<8x128xf32>
    %28 = arith.mulf %24, %1 : vector<8x128xf32>
    %29 = arith.mulf %27, %3 : vector<8x128xf32>
    %30 = arith.addf %28, %29 : vector<8x128xf32>
    %c0_11 = arith.constant 0 : index
    %c0_12 = arith.constant 0 : index
    %c0_13 = arith.constant 0 : index
    %31 = vector.load %arg6[%c0_11, %c0_12, %c0_13] : memref<1x8x128xf32, #tpu.memory_space<vmem>>, vector<1x8x128xf32>
    %32 = vector.shape_cast %31 : vector<1x8x128xf32> to vector<8x128xf32>
    %33 = vector.shape_cast %30 : vector<8x128xf32> to vector<1x8x128xf32>
    tpu.vector_store %arg6[%c0_11, %c0_12, %c0_13], %33 {strides = array<i32>} : memref<1x8x128xf32, #tpu.memory_space<vmem>>, vector<1x8x128xf32>,
    %c0_14 = arith.constant 0 : index
    %c0_15 = arith.constant 0 : index
    %c0_16 = arith.constant 0 : index
    %34 = vector.load %arg5[%c0_14, %c0_15, %c0_16] : memref<1x8x128xf32, #tpu.memory_space<vmem>>, vector<1x8x128xf32>
    %35 = vector.shape_cast %34 : vector<1x8x128xf32> to vector<8x128xf32>
    %c127_i32_17 = arith.constant 127 : i32
    %36 = tpu.dynamic_rotate %35 by %c127_i32_17 dim 1 : vector<8x128xf32>, i32 -> vector<8x128xf32>
    %c1_i32_18 = arith.constant 1 : i32
    %37 = tpu.dynamic_rotate %35 by %c1_i32_18 dim 1 : vector<8x128xf32>, i32 -> vector<8x128xf32>
    %38 = arith.select %22, %36, %37 : vector<8x128xi1>, vector<8x128xf32>
    %39 = arith.mulf %35, %1 : vector<8x128xf32>
    %40 = arith.mulf %38, %3 : vector<8x128xf32>
    %41 = arith.addf %39, %40 : vector<8x128xf32>
    %c0_19 = arith.constant 0 : index
    %c0_20 = arith.constant 0 : index
    %c0_21 = arith.constant 0 : index
    %42 = vector.load %arg7[%c0_19, %c0_20, %c0_21] : memref<1x8x128xf32, #tpu.memory_space<vmem>>, vector<1x8x128xf32>
    %43 = vector.shape_cast %42 : vector<1x8x128xf32> to vector<8x128xf32>
    %44 = vector.shape_cast %41 : vector<8x128xf32> to vector<1x8x128xf32>
    tpu.vector_store %arg7[%c0_19, %c0_20, %c0_21], %44 {strides = array<i32>} : memref<1x8x128xf32, #tpu.memory_space<vmem>>, vector<1x8x128xf32>,
    return
  }
  func.func @transform_0(%arg0: i32, %arg1: i32) -> (i32, i32) {
    %c0_i32 = arith.constant 0 : i32
    %c0_i32_0 = arith.constant 0 : i32
    return %arg0, %c0_i32 : i32, i32
  }
  func.func @transform_1(%arg0: i32, %arg1: i32) -> (i32, i32) {
    %c0_i32 = arith.constant 0 : i32
    %c0_i32_0 = arith.constant 0 : i32
    return %arg0, %c0_i32 : i32, i32
  }
  func.func @transform_2(%arg0: i32, %arg1: i32) -> (i32, i32, i32) {
    %c0_i32 = arith.constant 0 : i32
    %c0_i32_0 = arith.constant 0 : i32
    return %arg1, %arg0, %c0_i32 : i32, i32, i32
  }
  func.func @transform_3(%arg0: i32, %arg1: i32) -> (i32, i32, i32) {
    %c0_i32 = arith.constant 0 : i32
    %c0_i32_0 = arith.constant 0 : i32
    return %arg1, %arg0, %c0_i32 : i32, i32, i32
  }
  func.func @transform_4(%arg0: i32, %arg1: i32) -> (i32, i32, i32) {
    %c0_i32 = arith.constant 0 : i32
    %c0_i32_0 = arith.constant 0 : i32
    return %arg1, %arg0, %c0_i32 : i32, i32, i32
  }
  func.func @transform_5(%arg0: i32, %arg1: i32) -> (i32, i32, i32) {
    %c0_i32 = arith.constant 0 : i32
    %c0_i32_0 = arith.constant 0 : i32
    return %arg1, %arg0, %c0_i32 : i32, i32, i32
  }
}

</mosaic_0001>

<bundles_post_ra>
// kernel: tpu_custom_call.1
= control target key start
LH: loop header
LB: loop body
LE: loop exit
PB: predicated region body
PF: predicated region fallthrough
CT: control target
= control target key end

     0   :  { %s1436_s0 = inlined_call_operand.hbm [shape: f32[16,32], index: 0, kind: input, shape index: {}]   ;;  %s1437_s1 = inlined_call_operand.hbm [shape: f32[16,32], index: 1, kind: input, shape index: {}]   ;;  %s1438_s2 = inlined_call_operand.hbm [shape: f32[2,16,128], index: 2, kind: input, shape index: {}]   ;;  %s1439_s3 = inlined_call_operand.hbm [shape: f32[2,16,128], index: 3, kind: input, shape index: {}]   ;;  %s1440_s4 = inlined_call_operand.hbm [shape: f32[2,16,128], index: 4, kind: output, shape index: {0}]   ;;  %s1441_s5 = inlined_call_operand.hbm [shape: f32[2,16,128], index: 5, kind: output, shape index: {1}]  }
   0x1   :  { %1455 = sst [smem:[#allocation28_spill]] %s1436_s0 }
   0x2   :  { %1456 = sst [smem:[#allocation29_spill]] %s1437_s1 }
   0x3   :  { %1457 = sst [smem:[#allocation30_spill]] %s1438_s2 }
   0x4   :  { %1458 = sst [smem:[#allocation31_spill]] %s1440_s4 }
   0x5   :  { %1459 = sst [smem:[#allocation32_spill]] %s1441_s5 }
   0x6   :  { %11 = vsyncpa [#allocation3], 0 }
   0x7   :  { %13 = vsyncpa [#allocation3 + $0x1], 0 }
   0x8   :  { %14 = vsyncpa [#allocation6], 0 }
   0x9   :  { %16 = vsyncpa [#allocation6 + $0x1], 0 }
   0xa   :  { %17 = vsyncpa [#allocation9], 0 }
   0xb   :  { %19 = vsyncpa [#allocation9 + $0x1], 0 }
   0xc   :  { %20 = vsyncpa [#allocation4], 0 }
   0xd   :  { %22 = vsyncpa [#allocation4 + $0x1], 0 }
   0xe   :  { %23 = vsyncpa [#allocation12], 0 }
   0xf   :  { %25 = vsyncpa [#allocation12 + $0x1], 0  ;;  %s1163_s18 = smov 0   ;;  %s1165_s19 = smov 0  }
  0x10   :  { %s1167_s20 = smov 0   ;;  %s1169_s21 = smov 0  }
  0x11   :  { %s1171_s22 = smov 0   ;;  %s1173_s23 = smov 0  }
  0x12   :  { %s1175_s24 = smov 0   ;;  %s1177_s25 = smov 0  }
  0x13   :  { %s1179_s26 = smov 0   ;;  %s1181_s27 = smov 0  }
  0x14   :  { %s1183_s28 = smov 0  }
  0x15 LB: > { %1460 = sst [smem:[#allocation19_spill]] %s1086_s18  ;;  %s1217_s29 = sadd.s32 4294967295, %s1126_s28   ;;  %s1126_s28 = sphi %s1183_s28, %s31_s28   ;;  %s1122_s27 = sphi %s1181_s27, %s1497_s27   ;;  %s1118_s26 = sphi %s1179_s26, %s1504_s26   ;;  %s1114_s25 = sphi %s1177_s25, %s1495_s25   ;;  %s1110_s24 = sphi %s1175_s24, %s1494_s24   ;;  %s1106_s23 = sphi %s1173_s23, %s1503_s23   ;;  %s1102_s22 = sphi %s1171_s22, %s1502_s22   ;;  %s1098_s21 = sphi %s1169_s21, %s1501_s21   ;;  %s1094_s20 = sphi %s1167_s20, %s1500_s20   ;;  %s1090_s19 = sphi %s1165_s19, %s1499_s19   ;;  %s1086_s18 = sphi %s1163_s18, %s1498_s18  }
  0x16   : > { %1461 = sst [smem:[#allocation20_spill]] %s1114_s25  ;;  %s685_s30 = sadd.s32 4294967294, %s1126_s28  }
  0x17   : > { %1462 = sst [smem:[#allocation21_spill]] %s1118_s26  ;;  %p57_p0 = scmp.ne.s32.totalorder %s1106_s23, %s1102_s22 }
  0x18   : > { %1463 = sst [smem:[#allocation22_spill]] %s1122_s27  ;;  %p58_p1 = scmp.eq.s32.totalorder %s1126_s28, 0 }
  0x19   : > { %1464 = sst [smem:[#allocation23_spill]] %s1126_s28  ;;  %p63_p2 = scmp.ne.s32.totalorder %s1102_s22, %s1098_s21 }
  0x1a   : > { %p64_p3 = scmp.eq.s32.totalorder %s1217_s29, 0  ;;  %p1227_p4 = por %p58_p1, %p57_p0 }
  0x1b   : > { %p111_p5 = scmp.ne.s32.totalorder %s1094_s20, %s1090_s19  ;;  %p117_p7 = scmp.ne.s32.totalorder %s1090_s19, %s1086_s18 }
  0x1c   : > { %p1233_p6 = por %p64_p3, %p63_p2  ;;  %p171_p9 = scmp.eq.s32.totalorder %s1217_s29, 3 }
  0x1d   : > { %p1239_p8 = por %p111_p5, %p58_p1  ;;  %p1244_p10 = por %p117_p7, %p64_p3 }
  0x1e   : > { %p177_p11 = scmp.eq.s32.totalorder %s685_s30, 3  ;;  %p1248_p12 = por %p171_p9, %p111_p5 }
  0x1f   : > { %p745_p0 = scmp.lt.s32.totalorder %s1126_s28, 4  ;;  %s225_s14 = sand.u32 1, %s1106_s23  }
  0x20   : > { %s1469_s12 = scalar_select %p1248_p12, 1, 0 }
  0x21   : > { %p1252_p13 = por %p177_p11, %p117_p7  ;;  %s689_s15 = sshll.u32 %s1122_s27, 3 }
  0x22   : > { %1470 = sst [smem:[#allocation24_spill]] %s1469_s12  ;;  %s688_s16 = sshll.u32 %s225_s14, 3 }
  0x23   : > { %s1471_s13 = scalar_select %p1252_p13, 1, 0 }
  0x24   : > { %p1261_p1 = pnand %p745_p0, %p1227_p4  ;;  %s244_s21 = sand.u32 1, %s1126_s28  }
  0x25   : > { %1472 = sst [smem:[#allocation25_spill]] %s1471_s13  ;;  %s248_s18 = scalar_lea.vmem [#allocation5], %s688_s16 }
  0x26   : > { %s1474_s1 = sld [smem:[#allocation29_spill]]  ;;  %s256_s5 = sshll.u32 %s248_s18, 4  ;;  %s257_s5 = int_to_ptr.vmem [resolvable:$true] %s256_s5 }
  0x27   : > { %p1271_p2 = pnand %p745_p0, %p1239_p8  ;;  %s1275_s12 = scalar_lea.sflag [#allocation6], %s244_s21 }
  0x28   : > { %p698_p3 = scmp.ge.s32.totalorder %s1126_s28, 1  ;;  %p303_p4 = scmp.lt.s32.totalorder %s1126_s28, 5 }
  0x29   : > { %s1477_s0 = sld [smem:[#allocation28_spill]]  ;;  %s229_s21 = scalar_lea.vmem [#allocation2], %s688_s16 }
  0x2a   : > { %p1282_p5 = pnand %p698_p3, %p303_p4  ;;  %s237_s30 = sshll.u32 %s229_s21, 4  ;;  %s238_s30 = int_to_ptr.vmem [resolvable:$true] %s237_s30 }
  0x2b   : > { %s40_s28 = sadd.s32 1, %s1118_s26  ;;  %s1450_s4 = sand.u32 1, %s1094_s20  }
  0x2c   : > { %s252_s6 = scalar_lea.hbm %s1474_s1, %s689_s15  ;;  %p41_p7 = scmp.ge.s32.totalorder %s40_s28, 2 }
  0x2d   : > { %s254_s13 = sshll.u32 %s252_s6, 4  ;;  %s692_s6 = sshll.u32 %s1450_s4, 3  ;;  %s255_s13 = int_to_ptr.hbm [resolvable:$true] %s254_s13 }
  0x2e   : > { %731 = dma.hbm_to_vmem [thread:$0]  (!%p1261_p1), %s255_s13, 128, %s257_s5, %s1275_s12  }
  0x2f   : > { %s233_s10 = scalar_lea.hbm %s1477_s0, %s689_s15  ;;  %s226_s5 = scalar_lea.sflag [#allocation3], %s225_s14 }
  0x30   : > { %s235_s1 = sshll.u32 %s233_s10, 4  ;;  %s104_s13 = sadd.s32 1, %s1094_s20  ;;  %s236_s1 = int_to_ptr.hbm [resolvable:$true] %s235_s1 }
  0x31   : > { %728 = dma.hbm_to_vmem [thread:$0]  (!%p1261_p1), %s236_s1, 128, %s238_s30, %s226_s5  }
  0x32   : > { %s693_s7 = sshll.u32 %s1118_s26, 1  ;;  %s1506_s28 = smov (%p41_p7, %s40_s28), 0 }
  0x33   : > { %1478 = sst [smem:[#allocation26_spill]] %s1506_s28  ;;  %s1479_s15 = sadd.s32 1, %s1122_s27 }
  0x34   : > { %s1508_s15 = smov (!%p41_p7, %s1479_s15), %s1122_s27  ;;  %s99_s16 = ssub.s32 %s1118_s26, %s1506_s28 }
  0x35   : > { %s271_s14 = sadd.s32 %s1122_s27, %s693_s7  ;;  %p45_p8 = scmp.ge.s32.totalorder %s1508_s15, 2 }
  0x36   : > { %s694_s1 = sshll.u32 %s271_s14, 3  ;;  %s1480_s2 = sld [smem:[#allocation30_spill]] }
  0x37   : > { %s267_s30 = scalar_lea.vmem [#allocation7], %s692_s6  ;;  %s1510_s15 = smov (%p45_p8, %s1508_s15), 0 }
  0x38   : > { %s277_s5 = sshll.u32 %s267_s30, 4  ;;  %1481 = sst [smem:[#allocation27_spill]] %s1510_s15  ;;  %s278_s5 = int_to_ptr.vmem [resolvable:$true] %s277_s5 }
  0x39   : > { %s47_s0 = ssub.s32 %s1122_s27, %s1510_s15  ;;  %s1482_s28 = sadd.s32 1, %s1106_s23 }
  0x3a   : > { %p48_p9 = scmp.eq.s32.totalorder %s47_s0, 0  ;;  %s101_s7 = sor.u32 %s99_s16, %s47_s0 }
  0x3b   : > { %p102_p11 = scmp.eq.s32.totalorder %s101_s7, 0  ;;  %s294_s30 = scalar_lea.hbm %s1439_s3, %s694_s1 }
  0x3c   : > { %s273_s21 = scalar_lea.hbm %s1480_s2, %s694_s1  ;;  %s288_s2 = scalar_lea.vmem [#allocation8], %s692_s6 }
  0x3d   : > { %s275_s4 = sshll.u32 %s273_s21, 4  ;;  %s296_s21 = sshll.u32 %s294_s30, 4  ;;  %s276_s4 = int_to_ptr.hbm [resolvable:$true] %s275_s4  ;;  %s297_s21 = int_to_ptr.hbm [resolvable:$true] %s296_s21 }
  0x3e   : > { %s1315_s14 = scalar_select %p48_p9, %s1106_s23, %s1482_s28  }
  0x3f   : > { %s1318_s26 = scalar_select %p102_p11, %s1094_s20, %s104_s13  }
  0x40   : > { %734 = dma.hbm_to_vmem [thread:$0]  (!%p1271_p2), %s276_s4, 128, %s278_s5, %s1275_s12  }
  0x41   : > { %s298_s25 = sshll.u32 %s288_s2, 4  ;;  %s1483_s15 = sand.u32 1, %s1094_s20   ;;  %s299_s25 = int_to_ptr.vmem [resolvable:$true] %s298_s25 }
  0x42   : > { %s285_s27 = scalar_lea.sflag [#allocation9], %s1483_s15  ;;  %307 = sbr.rel (%p1282_p5) target bundleno = 235 (0xeb), region = 36 }
  0x43   : > { %737 = dma.hbm_to_vmem [thread:$0]  (!%p1271_p2), %s297_s21, 128, %s299_s25, %s285_s27  }
  0x44   : > { %s309_s0 = sand.u32 (!%p1282_p5), 1, %s1102_s22  }
  0x45   : > { %s699_s4 = sshll.u32 (!%p1282_p5), %s309_s0, 3  ;;  %s310_s28 = scalar_lea.sflag (!%p1282_p5), [#allocation3], %s309_s0 }
  0x46   : > { %s313_s12 = scalar_lea.vmem (!%p1282_p5), [#allocation2], %s699_s4 }
  0x47   : > { %1061 = dma.done.wait (%p1233_p6), %s310_s28, 128  }
  0x48   : > { %1063 = vsyncadd (%p1233_p6), %s310_s28, 4294967168  ;;  %s319_s2 = sand.u32 1, %s1217_s29   ;;  %s323_s8 = scalar_lea.vmem [#allocation5], %s699_s4 }
  0x49   : > { %s320_s13 = scalar_lea.sflag [#allocation6], %s319_s2 }
  0x4a   : > { %1065 = dma.done.wait (%p1233_p6), %s320_s13, 128  }
  0x4b   : > { %1067 = vsyncadd (%p1233_p6), %s320_s13, 4294967168  ;;  %s1343_s25 = sand.u32 1, %s1090_s19  }
  0x4c   : > { %s1346_s27 = sshll.u32 %s1343_s25, 3 }
  0x4d   : > { %s333_s18 = scalar_lea.vmem [#allocation7], %s1346_s27 }
  0x4e   : > { %1069 = dma.done.wait (%p1244_p10), %s320_s13, 128  }
  0x4f   : > { %1071 = vsyncadd (%p1244_p10), %s320_s13, 4294967168  ;;  %s340_s29 = scalar_lea.sflag [#allocation9], %s1343_s25  ;;  %s343_s9 = scalar_lea.vmem [#allocation8], %s1346_s27 }
  0x50   : > { %1073 = dma.done.wait (%p1244_p10), %s340_s29, 128  }
  0x51   : > { %1075 = vsyncadd (%p1244_p10), %s340_s29, 4294967168  ;;  %v391_v0 = vld [vmem:[%s313_s12] sm:$0xff]  ;;  %s1128_s6 = smov 64   ;;  %s1129_s15 = smov 32   ;;  %v408_v1 = vld [vmem:[%s323_s8] sm:$0xff]  ;;  %v422_v6 = vlaneseq  ;;  %vm402_vm0 = vcmask 261120  }
  0x52   : > { %396 = vrot.lane.b32.xlu1 %v391_v0, %s1128_s6  ;;  %393 = vrot.lane.b32.xlu0 %v391_v0, %s1129_s15  ;;  %s1130_s16 = smov 96   ;;  %v437_v2 = vld [vmem:[%s333_s18] sm:$0xff]  ;;  %s1131_s1 = smov 1   ;;  %v447_v3 = vld [vmem:[%s343_s9] sm:$0xff]  ;;  %vm404_vm1 = vcmask 523264   ;;  %vm406_vm2 = vcmask 785408  }
  0x53   : > { %399 = vrot.lane.b32.xlu2 %v391_v0, %s1130_s16  ;;  %s1484_s5 = sld [smem:[#allocation20_spill]]  ;;  %s1132_s7 = smov 127   ;;  %v423_v8 = vand.u32 127, %v422_v6 }
  0x54   : > { %s707_s11 = sshll.u32 %s1110_s24, 1  ;;  %s1487_s21 = sld [smem:[#allocation31_spill]] }
  0x55   : > { %v428_v12 = vand.u32 1, %v423_v8  ;;  %s383_s28 = scalar_lea.vmem [#allocation10], %s1346_s27  ;;  %s1490_s29 = sld [smem:[#allocation32_spill]] }
  0x56   : > { %s477_s2 = sshll.u32 %s383_s28, 4  ;;  %s478_s2 = int_to_ptr.vmem [resolvable:$true] %s477_s2 }
  0x57   : > { %vm1361_vm3 = vcmp.eq.s32.totalorder %v428_v12, 0 }
  0x59   : > { %s473_s17 = sadd.s32 %s1484_s5, %s707_s11 }
  0x5a   : > { %413 = vrot.lane.b32.xlu1 %v408_v1, %s1128_s6  ;;  %410 = vrot.lane.b32.xlu0 %v408_v1, %s1129_s15  ;;  %s708_s10 = sshll.u32 %s473_s17, 3  ;;  %s1488_s0 = smov %s1487_s21 }
  0x5b   : > { %416 = vrot.lane.b32.xlu2 %v408_v1, %s1130_s16  ;;  %s475_s4 = scalar_lea.hbm %s1487_s21, %s708_s10  ;;  %s491_s9 = scalar_lea.hbm %s1490_s29, %s708_s10 }
  0x5c   : > { %s479_s13 = sshll.u32 %s475_s4, 4  ;;  %s458_s6 = scalar_lea.sflag [#allocation4], %s1343_s25  ;;  %s480_s13 = int_to_ptr.hbm [resolvable:$true] %s479_s13 }
  0x5d   : > { %s974_s15 = sshra.s32 %s480_s13, 4  ;;  %s975_s15 = int_to_ptr.hbm [resolvable:$true] %s974_s15 }
  0x5e   : > { %s976_s16 = scalar_lea.hbm %s975_s15, 8  ;;  %p981_p1 = scmp.lt.s32.totalorder %s975_s15, %s1488_s0 }
  0x5f   : > { %p977_p6 = scmp.ne.s32.totalorder %s975_s15, %s976_s16 }
  0x61   : > { %p978_p10 = pnand %p977_p6, %p1248_p12 }
  0x62   : > { %440 = vrot.lane.b32.xlu1 %v437_v2, %s1131_s1  ;;  %438 = vrot.lane.b32.xlu0 %v437_v2, %s1132_s7 }
  0x63   : > { %448 = vrot.lane.b32.xlu2 %v447_v3, %s1132_s7  ;;  %p979_p0 = pneg %p978_p10  ;;  %s980_s7 = scalar_lea.hbm %s1488_s0, 32 }
  0x64   : > { %p982_p2 = scmp.lt.s32.totalorder %s980_s7, %s976_s16 }
  0x66   : > { %p983_p3 = por %p982_p2, %p981_p1 }
  0x68   : > { %p984_p4 = pnand %p983_p3, %p979_p0 }
  0x6a   : > { %450 = vrot.lane.b32.xlu0 %v447_v3, %s1131_s1 }
  0xad   : > { %v400_v7 = vpop.permute.xlu2 %399 }
  0xb5   : > { %v417_v15 = vpop.permute.xlu2 %416 }
  0xbd   : > { %v449_v26 = vpop.permute.xlu2 %448 }
  0xc4   : > { %v397_v4 = vpop.permute.xlu1 %396  ;;  %v394_v5 = vpop.permute.xlu0 %393 }
  0xc5   : > { %v403_v11 = vsel %vm402_vm0, %v391_v0, %v394_v5 }
  0xc6   : > { %v405_v14 = vsel %vm404_vm1, %v403_v11, %v397_v4 }
  0xc7   : > { %v407_v18 = vsel %vm406_vm2, %v405_v14, %v400_v7 }
  0xc8   : > { %v443_v23 = vmul.f32 %v437_v2, %v407_v18 }
  0xcc   : > { %v414_v9 = vpop.permute.xlu1 %413  ;;  %v411_v10 = vpop.permute.xlu0 %410 }
  0xcd   : > { %v419_v13 = vsel %vm402_vm0, %v408_v1, %v411_v10 }
  0xce   : > { %v420_v16 = vsel %vm404_vm1, %v419_v13, %v414_v9 }
  0xcf   : > { %v421_v21 = vsel %vm406_vm2, %v420_v16, %v417_v15 }
  0xd4   : > { %v441_v19 = vpop.permute.xlu1 %440  ;;  %v439_v20 = vpop.permute.xlu0 %438 }
  0xd5   : > { %v442_v22 = vsel %vm1361_vm3, %v439_v20, %v441_v19 }
  0xd6   : > { %v444_v24 = vmul.f32 %v442_v22, %v421_v21 }
  0xd8   : > { %v445_v25 = vadd.f32 %v444_v24, %v443_v23 }
  0xda   : > { %446 = vst [vmem:[%s383_s28] sm:$0xff] %v445_v25 }
  0xdb   : > { %987 = shalt.err (!%p984_p4)
}
  0xdc   : > { %721 = dma.vmem_to_hbm [thread:$0]  (%p1248_p12), %s478_s2, 128, %s480_s13, %s458_s6   ;;  %v451_v27 = vpop.permute.xlu0 %450  ;;  %v453_v29 = vmul.f32 %v447_v3, %v407_v18 }
  0xdd   : > { %v452_v28 = vsel %vm1361_vm3, %v449_v26, %v451_v27  ;;  %s390_s10 = scalar_lea.vmem [#allocation11], %s1346_s27  ;;  %s495_s30 = sshll.u32 %s491_s9, 4  ;;  %s496_s30 = int_to_ptr.hbm [resolvable:$true] %s495_s30 }
  0xde   : > { %s493_s24 = sshll.u32 %s390_s10, 4  ;;  %v454_v30 = vmul.f32 %v452_v28, %v421_v21  ;;  %s463_s21 = scalar_lea.sflag [#allocation12], %s1343_s25  ;;  %s494_s24 = int_to_ptr.vmem [resolvable:$true] %s493_s24 }
  0xdf   : > { %s1002_s4 = sshra.s32 %s496_s30, 4  ;;  %s1008_s27 = scalar_lea.hbm %s1490_s29, 32  ;;  %s1003_s4 = int_to_ptr.hbm [resolvable:$true] %s1002_s4 }
  0xe0   : > { %v455_v31 = vadd.f32 %v454_v30, %v453_v29  ;;  %s1004_s28 = scalar_lea.hbm %s1003_s4, 8  ;;  %p1009_p9 = scmp.lt.s32.totalorder %s1003_s4, %s1490_s29 }
  0xe1   : > { %p1005_p5 = scmp.ne.s32.totalorder %s1003_s4, %s1004_s28  ;;  %p1010_p11 = scmp.lt.s32.totalorder %s1008_s27, %s1004_s28 }
  0xe2   : > { %456 = vst [vmem:[%s390_s10] sm:$0xff] %v455_v31 }
  0xe3   : > { %p1006_p7 = pnand %p1005_p5, %p1248_p12  ;;  %p1011_p6 = por %p1010_p11, %p1009_p9 }
  0xe5   : > { %p1007_p8 = pneg %p1006_p7 }
  0xe7   : > { %p1012_p10 = pnand %p1011_p6, %p1007_p8 }
  0xe9   : > { %1015 = shalt.err (!%p1012_p10)
}
  0xea   : > { %722 = dma.vmem_to_hbm [thread:$0]  (%p1248_p12), %s494_s24, 128, %s496_s30, %s463_s21  }
  0xeb PF: > { %s1491_s25 = sld [smem:[#allocation23_spill]] }
  0xec   : > { %s1492_s9 = sld [smem:[#allocation19_spill]] }
  0xf1   : > { %p746_p0 = scmp.ge.s32.totalorder %s1491_s25, 2 }
  0xf2   : > { %s507_s15 = sand.u32 1, %s1492_s9  }
  0xf3   : > { %p739_p1 = pnand %p746_p0, %p1252_p13  ;;  %s508_s16 = scalar_lea.sflag [#allocation4], %s507_s15 }
  0xf5   : > { %p740_p2 = pneg %p739_p1 }
  0xf7   : > { %1077 = dma.done.wait (%p740_p2), %s508_s16, 128  }
  0xf8   : > { %1079 = vsyncadd (%p740_p2), %s508_s16, 4294967168  ;;  %s518_s1 = scalar_lea.sflag [#allocation12], %s507_s15 }
  0xf9   : > { %1081 = dma.done.wait (%p740_p2), %s518_s1, 128  }
  0xfa   : > { %1083 = vsyncadd (%p740_p2), %s518_s1, 4294967168  ;;  %s31_s28 = sadd.s32 1, %s1491_s25   ;;  %s1494_s24 = sld [smem:[#allocation21_spill]] }
  0xfb   : > { %p28_p3 = scmp.ge.s32.totalorder %s31_s28, 6   ;;  %s1495_s25 = sld [smem:[#allocation22_spill]] }
  0xfc   : > { %s1496_s12 = sld [smem:[#allocation26_spill]]  ;;  %s1498_s18 = smov %s1090_s19 }
  0xfd   : > { %s1497_s27 = sld [smem:[#allocation27_spill]]  ;;  %s1499_s19 = smov %s1094_s20 }
  0xfe   : > { %s1500_s20 = smov %s1318_s26  ;;  %s1501_s21 = smov %s1102_s22 }
  0xff   : > { %s1502_s22 = smov %s1106_s23  ;;  %s1503_s23 = smov %s1315_s14 }
 0x100   :  { %30 = sbr.rel (!%p28_p3) target bundleno = 21 (0x15), region = 135 }
 0x102   : > { %s1504_s26 = smov %s1496_s12 }
 0x105   :  { %524 = vsyncpa [#allocation3], 1 }
 0x106   :  { %526 = vsyncpa [#allocation3 + $0x1], 1 }
 0x107   :  { %527 = vsyncpa [#allocation6], 1 }
 0x108   :  { %529 = vsyncpa [#allocation6 + $0x1], 1 }
 0x109   :  { %530 = vsyncpa [#allocation9], 1 }
 0x10a   :  { %532 = vsyncpa [#allocation9 + $0x1], 1 }
 0x10b   :  { %533 = vsyncpa [#allocation4], 1 }
 0x10c   :  { %535 = vsyncpa [#allocation4 + $0x1], 1 }
 0x10d   :  { %536 = vsyncpa [#allocation12], 1 }
 0x10e   :  { %538 = vsyncpa [#allocation12 + $0x1], 1 }

</bundles_post_ra>
